<compile_context>
chip_gen: v7x
topology: tpu7x:2x2x1
jax: 0.10.0
libtpu: 0.0.40
codegen_flags: <defaults>
</compile_context>

<pallas_src>
import functools

import jax
import jax.numpy as jnp
from jax.experimental import pallas as pl
from jax.experimental.pallas import tpu as pltpu

LANE = 128
SUBLANE = 8


def _round_up(n, m):
    return ((n + m - 1) // m) * m


def rnn_cell_kernel(x_ref, h_ref, wx_ref, wh_ref, b_ref, y_ref, *, H, O):
    """One fused RNN cell step.

    x_ref:  (Bp, I)       input rows (batch padded to a multiple of 8)
    h_ref:  (Bp, H)       hidden state rows
    wx_ref: (I,  Fp)      fused [hidden | output | pad] weights, input part
    wh_ref: (H,  Fp)      fused [hidden | output | pad] weights, hidden part
    b_ref:  (1,  Fp)      fused bias
    y_ref:  (Bp, Fp)      columns [0, H) = new hidden, [H, H+O) = log_softmax(logits)
    """
    x = x_ref[...]
    h = h_ref[...]

    # Single fused matmul:  [x | h] @ [Wx ; Wh] + b   (MXU, f32 accumulate).
    y = (
        jnp.dot(x, wx_ref[...], preferred_element_type=jnp.float32)
        + jnp.dot(h, wh_ref[...], preferred_element_type=jnp.float32)
        + b_ref[...]
    )

    # Lane mask selecting the logit columns [H, H+O); hidden columns and the zero
    # padding must NOT participate in the log-softmax reductions.
    col = jax.lax.broadcasted_iota(jnp.int32, y.shape, 1)
    is_logit = jnp.logical_and(col >= H, col < H + O)

    masked = jnp.where(is_logit, y, -jnp.inf)
    m = jnp.max(masked, axis=1, keepdims=True)          # row max over real logits
    e = jnp.exp(masked - m)                              # exp(-inf) == 0 off-logit
    lse = jnp.log(jnp.sum(e, axis=1, keepdims=True)) + m

    # Logit lanes -> log-softmax; hidden (and pad) lanes pass through unchanged.
    y_ref[...] = jnp.where(is_logit, y - lse, y).astype(y_ref.dtype)


@functools.partial(jax.jit, static_argnames=("hidden_size", "output_size"))
def rnn_forward(input_tensor, hidden_tensor, params, *, hidden_size, output_size):
    """Pallas equivalent of RNN.forward. Returns (log_softmax_output, new_hidden)."""
    B = input_tensor.shape[0]
    H, O = hidden_size, output_size
    Fp = params["w_x"].shape[1]

    # Sublane-align the batch (cheap; keeps the output store dense on the sublane axis).
    Bp = _round_up(max(B, 1), SUBLANE)
    x = input_tensor
    h = hidden_tensor
    if Bp != B:
        x = jnp.pad(x, ((0, Bp - B), (0, 0)))
        h = jnp.pad(h, ((0, Bp - B), (0, 0)))

    kernel = functools.partial(rnn_cell_kernel, H=H, O=O)
    y = pl.pallas_call(
        kernel,
        out_shape=jax.ShapeDtypeStruct((Bp, Fp), jnp.float32),
        in_specs=[
            pl.BlockSpec(memory_space=pltpu.MemorySpace.VMEM),  # x
            pl.BlockSpec(memory_space=pltpu.MemorySpace.VMEM),  # h
            pl.BlockSpec(memory_space=pltpu.MemorySpace.VMEM),  # w_x
            pl.BlockSpec(memory_space=pltpu.MemorySpace.VMEM),  # w_h
            pl.BlockSpec(memory_space=pltpu.MemorySpace.VMEM),  # b
        ],
        out_specs=pl.BlockSpec(memory_space=pltpu.MemorySpace.VMEM),
    )(x, h, params["w_x"], params["w_h"], params["b"])

    hidden = y[:B, :H]
    output = y[:B, H:H + O]
    return output, hidden


def init_params(key, input_size, hidden_size, output_size):
    """nn.Linear-shaped params plus the fused/padded kernel layout.

    nn.Linear(in, out) has weight (out, in); we store the transposed (in, out) form,
    then fuse input_2_hidden and input_2_output along the output axis at init time and
    zero-pad the fused width to a multiple of 128 (lane-dense).
    """
    I, H, O = input_size, hidden_size, output_size
    in_feat = I + H
    k1, k2, k3, k4 = jax.random.split(key, 4)
    bound = 1.0 / (float(in_feat) ** 0.5)

    wh = jax.random.uniform(k1, (in_feat, H), jnp.float32, -bound, bound)
    bh = jax.random.uniform(k2, (1, H), jnp.float32, -bound, bound)
    wo = jax.random.uniform(k3, (in_feat, O), jnp.float32, -bound, bound)
    bo = jax.random.uniform(k4, (1, O), jnp.float32, -bound, bound)

    F = H + O
    Fp = _round_up(F, LANE)
    w_full = jnp.concatenate([wh, wo], axis=1)                 # (I+H, H+O)
    b_full = jnp.concatenate([bh, bo], axis=1)                 # (1,   H+O)
    w_full = jnp.pad(w_full, ((0, 0), (0, Fp - F)))            # (I+H, Fp)
    b_full = jnp.pad(b_full, ((0, 0), (0, Fp - F)))            # (1,   Fp)

    return {
        # reference (unfused) layout
        "wh": wh, "bh": bh, "wo": wo, "bo": bo,
        # kernel (fused, split, lane-padded) layout
        "w_x": w_full[:I],   # (I, Fp)
        "w_h": w_full[I:],   # (H, Fp)
        "b": b_full,         # (1, Fp)
    }


def rnn_forward_ref(input_tensor, hidden_tensor, params):
    """Pure-JAX reference matching the PyTorch module exactly."""
    combined = jnp.concatenate([input_tensor, hidden_tensor], axis=1)
    hid = combined @ params["wh"] + params["bh"]
    logits = combined @ params["wo"] + params["bo"]
    out = jax.nn.log_softmax(logits, axis=1)
    return out, hid


if __name__ == "__main__":
    batch = 2
    input_size = 16
    hidden_size = 32
    output_size = 8

    key = jax.random.PRNGKey(0)
    kx, kp = jax.random.split(key, 2)

    x = jax.random.normal(kx, (batch, input_size), jnp.float32)
    # Matches RNN.init_hidden semantics (zeros), broadcast to batch rows.
    h0 = jnp.zeros((batch, hidden_size), jnp.float32)
    params = init_params(kp, input_size, hidden_size, output_size)

    out, hid = rnn_forward(
        x, h0, params, hidden_size=hidden_size, output_size=output_size
    )
    out = jax.block_until_ready(out)
    hid = jax.block_until_ready(hid)

    out_ref, hid_ref = rnn_forward_ref(x, h0, params)
    assert out.shape == (batch, output_size) and hid.shape == (batch, hidden_size)
    assert jnp.allclose(out, out_ref, atol=1e-5, rtol=1e-5), "output mismatch"
    assert jnp.allclose(hid, hid_ref, atol=1e-5, rtol=1e-5), "hidden mismatch"

    print("KERNEL_OK")
</pallas_src>

<mosaic_0001>
module attributes {stable_mosaic.version = 11 : i64} {
  func.func @rnn_cell_kernel(%arg0: memref<8x16xf32, #tpu.memory_space<vmem>>, %arg1: memref<8x32xf32, #tpu.memory_space<vmem>>, %arg2: memref<16x128xf32, #tpu.memory_space<vmem>>, %arg3: memref<32x128xf32, #tpu.memory_space<vmem>>, %arg4: memref<1x128xf32, #tpu.memory_space<vmem>>, %arg5: memref<8x128xf32, #tpu.memory_space<vmem>>) attributes {dimension_semantics = [], scalar_prefetch = 0 : i64, scratch_operands = 0 : i64, tpu.core_type = #tpu.core_type<tc>} {
    %c0 = arith.constant 0 : index
    %c0_0 = arith.constant 0 : index
    %0 = vector.load %arg0[%c0, %c0_0] : memref<8x16xf32, #tpu.memory_space<vmem>>, vector<8x16xf32>
    %c0_1 = arith.constant 0 : index
    %c0_2 = arith.constant 0 : index
    %1 = vector.load %arg1[%c0_1, %c0_2] : memref<8x32xf32, #tpu.memory_space<vmem>>, vector<8x32xf32>
    %c0_3 = arith.constant 0 : index
    %c0_4 = arith.constant 0 : index
    %2 = vector.load %arg2[%c0_3, %c0_4] : memref<16x128xf32, #tpu.memory_space<vmem>>, vector<16x128xf32>
    %cst = arith.constant dense<0.000000e+00> : vector<8x128xf32>
    %3 = tpu.matmul %0, %2, %cst {dimension_numbers = #tpu.dot_dimension_numbers<[1], [0], [0], [1], [0, 0, 1, 1], [], []>} : vector<8x16xf32>, vector<16x128xf32>, vector<8x128xf32> -> vector<8x128xf32>
    %c0_5 = arith.constant 0 : index
    %c0_6 = arith.constant 0 : index
    %4 = vector.load %arg3[%c0_5, %c0_6] : memref<32x128xf32, #tpu.memory_space<vmem>>, vector<32x128xf32>
    %cst_7 = arith.constant dense<0.000000e+00> : vector<8x128xf32>
    %5 = tpu.matmul %1, %4, %cst_7 {dimension_numbers = #tpu.dot_dimension_numbers<[1], [0], [0], [1], [0, 0, 1, 1], [], []>} : vector<8x32xf32>, vector<32x128xf32>, vector<8x128xf32> -> vector<8x128xf32>
    %6 = arith.addf %3, %5 : vector<8x128xf32>
    %c0_8 = arith.constant 0 : index
    %c0_9 = arith.constant 0 : index
    %7 = vector.load %arg4[%c0_8, %c0_9] : memref<1x128xf32, #tpu.memory_space<vmem>>, vector<1x128xf32>
    %8 = vector.broadcast %7 : vector<1x128xf32> to vector<8x128xf32>
    %9 = arith.addf %6, %8 : vector<8x128xf32>
    %10 = tpu.iota {dimensions = array<i32: 1>} : vector<8x128xi32>
    %c32_i32 = arith.constant 32 : i32
    %11 = vector.broadcast %c32_i32 : i32 to vector<8x128xi32>
    %12 = arith.cmpi sge, %10, %11 : vector<8x128xi32>
    %c40_i32 = arith.constant 40 : i32
    %13 = vector.broadcast %c40_i32 : i32 to vector<8x128xi32>
    %14 = arith.cmpi slt, %10, %13 : vector<8x128xi32>
    %15 = arith.andi %12, %14 : vector<8x128xi1>
    %cst_10 = arith.constant 0xFF800000 : f32
    %16 = vector.broadcast %cst_10 : f32 to vector<8x128xf32>
    %17 = arith.select %15, %9, %16 : vector<8x128xi1>, vector<8x128xf32>
    %cst_11 = arith.constant dense<0xFF800000> : vector<8xf32>
    %18 = vector.multi_reduction <maximumf>, %17, %cst_11 [1] : vector<8x128xf32> to vector<8xf32>
    %19 = vector.shape_cast %18 : vector<8xf32> to vector<8x1xf32>
    %20 = vector.broadcast %19 : vector<8x1xf32> to vector<8x128xf32>
    %21 = arith.subf %17, %20 : vector<8x128xf32>
    %22 = math.exp %21 : vector<8x128xf32>
    %cst_12 = arith.constant dense<0.000000e+00> : vector<8xf32>
    %23 = vector.multi_reduction <add>, %22, %cst_12 [1] : vector<8x128xf32> to vector<8xf32>
    %24 = vector.shape_cast %23 : vector<8xf32> to vector<8x1xf32>
    %25 = math.log %24 : vector<8x1xf32>
    %26 = arith.addf %25, %19 : vector<8x1xf32>
    %27 = vector.broadcast %26 : vector<8x1xf32> to vector<8x128xf32>
    %28 = arith.subf %9, %27 : vector<8x128xf32>
    %29 = arith.select %15, %28, %9 : vector<8x128xi1>, vector<8x128xf32>
    %c0_13 = arith.constant 0 : index
    %c0_14 = arith.constant 0 : index
    %30 = vector.load %arg5[%c0_13, %c0_14] : memref<8x128xf32, #tpu.memory_space<vmem>>, vector<8x128xf32>
    tpu.vector_store %arg5[%c0_13, %c0_14], %29 {strides = array<i32>} : memref<8x128xf32, #tpu.memory_space<vmem>>, vector<8x128xf32>,
    return
  }
}

</mosaic_0001>

<bundles_post_ra>
// kernel: rnn_forward.1
= control target key start
LH: loop header
LB: loop body
LE: loop exit
PB: predicated region body
PF: predicated region fallthrough
CT: control target
= control target key end

     0   :  { %10 = vsyncpa [#allocation3], 0  ;;  %s294_s18 = smov [#allocation2]   ;;  %s374_s0 = inlined_call_operand.vmem [shape: f32[8,16], index: 0, kind: input, shape index: {}]   ;;  %s375_s1 = inlined_call_operand.vmem [shape: f32[8,32], index: 1, kind: input, shape index: {}]   ;;  %s376_s2 = inlined_call_operand.hbm [shape: f32[16,128], index: 2, kind: input, shape index: {}]   ;;  %s377_s3 = inlined_call_operand.vmem [shape: f32[32,128], index: 3, kind: input, shape index: {}]   ;;  %s378_s4 = inlined_call_operand.vmem [shape: f32[1,128], index: 4, kind: input, shape index: {}]   ;;  %s379_s5 = inlined_call_operand.vmem [shape: f32[8,128], index: 5, kind: output, shape index: {}]  }
   0x1   :  { %s20_s19 = sshll.u32 %s294_s18, 4  ;;  %s270_s22 = scalar_lea.hbm %s376_s2, 256  ;;  %s21_s19 = int_to_ptr.vmem [resolvable:$true] %s20_s19 }
   0x2   :  { %p271_p0 = scmp.ne.s32.totalorder %s376_s2, %s270_s22  ;;  %p274_p1 = scmp.lt.u32.totalorder %s270_s22, %s376_s2 }
   0x4   :  { %p276_p2 = pnand %p274_p1, %p271_p0 }
   0x6   :  { %279 = shalt.err (!%p276_p2)
}
   0x7   :  { %s280_s27 = scalar_lea.vmem %s21_s19, 256  ;;  %p285_p4 = scmp.lt.s32.totalorder %s21_s19, %s21_s19 }
   0x8   :  { %p281_p3 = scmp.ne.s32.totalorder %s21_s19, %s280_s27  ;;  %p286_p5 = scmp.lt.s32.totalorder %s280_s27, %s280_s27 }
   0xa   :  { %p287_p6 = por %p286_p5, %p285_p4 }
   0xc   :  { %p288_p7 = pnand %p287_p6, %p281_p3 }
   0xe   :  { %291 = shalt.err (!%p288_p7)
}
   0xf   :  { %s295_s28 = smov 128   ;;  %s296_s29 = smov 8  }
  0x10   :  { %26 = dma.hbm_to_vmem [thread:$0]  %s376_s2, 256, %s21_s19, [#allocation3], %s295_s28, %s295_s28, %s296_s29  }
  0x11   :  { %292 = dma.done.wait [#allocation3], 256  }
  0x12   :  { %293 = vsyncadd [#allocation3], 4294967040  ;;  %v297_v0 = vmov 0.0|0.0   ;;  %vm298_vm0 = vmmov 0   ;;  %v299_v1 = vmov 0.0   ;;  %v38_v2 = vld [vmem:[%s377_s3] sm:$0xff]  ;;  %v198_v13 = vlaneseq }
  0x13   :  { %251 = vmatprep.subr.bf16.mxu0 %v297_v0  ;;  %257 = vmatprep.subr.bf16.mxu1 %v297_v0  ;;  %v39_v3 = vld [vmem:[%s377_s3 + $0x8] sm:$0xff]  ;;  %v36_v4 = vld [vmem:[#allocation2] sm:$0xff]  ;;  %v40_v7 = vld [vmem:[%s377_s3 + $0x10] sm:$0xff]  ;;  %vm116_vm1 = vcmask 130048   ;;  %vm42_vm2 = vcmask 261120  }
  0x14   :  { %248 = vmatprep.mubr.msk.f32.mxu1 %vm298_vm0, %v299_v1  ;;  %241 = vmatprep.mubr.msk.f32.mxu0 %vm298_vm0, %v299_v1  ;;  %v252_v5 = vpack.c.bf16 %v39_v3, %v38_v2  ;;  %v37_v6 = vld [vmem:[#allocation2 + $0x8] sm:$0xff]  ;;  %v41_v8 = vld [vmem:[%s377_s3 + $0x18] sm:$0xff]  ;;  %v34_v11 = vld [vmem:[%s374_s0] sm:$0xff]  ;;  %v199_v14 = vand.u32 127, %v198_v13 }
  0x15   :  { %v258_v9 = vpack.c.bf16 %v37_v6, %v36_v4  ;;  %v255_v10 = vpack.c.bf16 %v41_v8, %v40_v7  ;;  %v35_v12 = vld [vmem:[%s375_s1] sm:$0xff] }
  0x16   :  { %253 = vmatpush3.bf16.msra.mxu0 %v252_v5  ;;  %vm200_vm3 = vcmp.ge.s32.totalorder %v199_v14, 32  ;;  %vm201_vm4 = vcmp.lt.s32.totalorder %v199_v14, 40  ;;  %v224_v18 = vld [vmem:[%s378_s4] ss:$0 sm:$0xff] }
  0x17   :  { %254 = vmatprep.subr.bf16.mxu0 %v297_v0  ;;  %259 = vmatpush3.bf16.msra.mxu1 %v258_v9  ;;  %vm363_vm5 = vmand %vm200_vm3, %vm201_vm4 }
  0x1a   :  { %256 = vmatpush3.bf16.msra.mxu0 %v255_v10  ;;  %249 = vmatmul.mubr.msk.f32.vlgmr.msra.gmra.mrb[0].mxu1 %vm116_vm1, %v34_v11 }
  0x1d   :  { %242 = vmatmul.mubr.msk.f32.vlgmr.msra.gmra.mrb[0].mxu0 %vm42_vm2, %v35_v12 }
  0xed   :  { %v186_v15 = vpop.f32.mrb[0].mxu1 }
  0xee   :  { %v250_v16 = vpop.f32.mrb[1].mxu1 }
  0xf0   :  { %v112_v17 = vpop.f32.mrb[0].mxu0 }
  0xf1   :  { %v187_v19 = vadd.f32 %v186_v15, %v112_v17  ;;  %v243_v20 = vpop.f32.mrb[1].mxu0 }
  0xf3   :  { %v197_v22 = vadd.f32 %v224_v18, %v187_v19 }
  0xf5   :  { %v203_v23 = vsel %vm363_vm5, %v197_v22, -inf }
  0xf6   :  { %204 = vmax.xlane.f32.xlu0 %v203_v23 }
 0x183   :  { %v205_v24 = vpop.xlane.xlu0 %204 }
 0x184   :  { %v206_v25 = vsub.f32 %v203_v23, %v205_v24 }
 0x186   :  { %v207_v26 = vmul.f32 1.442695, %v206_v25 }
 0x188   :  { %266 = vpow2.f32 %v207_v26 }
 0x192   :  { %v267_v27 = vpop.eup %266 }
 0x193   :  { %209 = vadd.xlane.f32.xlu0 %v267_v27 }
 0x220   :  { %v210_v28 = vpop.xlane.xlu0 %209 }
 0x221   :  { %268 = vlog2.f32 %v210_v28 }
 0x22b   :  { %v269_v29 = vpop.eup %268 }
 0x22c   :  { %v212_v30 = vmul.f32 0.6931472, %v269_v29 }
 0x22e   :  { %v213_v31 = vadd.f32 %v212_v30, %v205_v24 }
 0x230   :  { %v214_v32 = vsub.f32 %v197_v22, %v213_v31 }
 0x232   :  { %v215_v33 = vsel %vm363_vm5, %v214_v32, %v197_v22 }
 0x233   :  { %216 = vst [vmem:[%s379_s5] sm:$0xff] %v215_v33 }
 0x234   :  { %221 = vsyncpa [#allocation3], 1 }

</bundles_post_ra>
